<compile_context>
chip_gen: v6e
topology: v6e:2x2x1
jax: 0.10.0
libtpu: 0.0.40
codegen_flags: <defaults>
</compile_context>

<pallas_src>
import jax
import jax.numpy as jnp
from jax.experimental import pallas as pl
from jax.experimental.pallas import tpu as pltpu

EPS = 1e-5


def _residual_block_kernel(x_ref, b1_ref, g1_ref, bt1_ref,
                           b2_ref, g2_ref, bt2_ref,
                           sel_ref, selt_ref, out_ref):
    # x_ref    : (H, N*W*C)  f32 lane-dense activations (batch folded into lanes)
    # b*_ref   : (3*N*W*C, N*W*C) bf16 K-concatenated, block-diagonal-over-N conv weights
    # g*/bt*   : (1, C)      f32 BN gamma / beta
    # sel_ref  : (N*W*C, C)  f32 per-channel reduction selector; selt_ref: (C, N*W*C)
    # out_ref  : (H, N*W*C)  f32
    R, L = x_ref.shape
    C = sel_ref.shape[1]
    inv_m = 1.0 / float(R * (L // C))          # 1 / (N*H*W)

    x = x_ref[...]
    sel = sel_ref[...]
    selt = selt_ref[...]

    def conv3x3(a, bcat_ref):
        # Vertical taps: zero-padded sublane shifts (rows are pure H now, so no
        # batch-boundary handling is needed).  Horizontal taps + channel
        # contraction live inside the (3L, L) weight slab; the three kernel
        # rows are contracted in ONE bf16 MXU matmul with K = 3L.
        zrow = jnp.zeros((1, L), a.dtype)
        up = jnp.concatenate([zrow, a[:R - 1, :]], axis=0)   # up[r] = a[r-1], 0 at r=0
        dn = jnp.concatenate([a[1:, :], zrow], axis=0)       # dn[r] = a[r+1], 0 at r=R-1
        cat = jnp.concatenate([up, a, dn], axis=1)           # (R, 3L), f32
        return jnp.dot(cat.astype(jnp.bfloat16), bcat_ref[...],
                       preferred_element_type=jnp.float32)   # (R, L), f32

    def batchnorm(a, g_ref, bt_ref):
        # Training-mode BN: single pass over `a` (sum + sum of squares), stats
        # and scale/shift entirely in f32, batched into two M=2 matmuls.
        stats = jnp.concatenate(
            [jnp.sum(a, axis=0, keepdims=True),
             jnp.sum(a * a, axis=0, keepdims=True)], axis=0)          # (2, L)
        stats_c = jnp.dot(stats, sel,
                          preferred_element_type=jnp.float32) * inv_m  # (2, C)
        mean = stats_c[0:1, :]
        var = stats_c[1:2, :] - mean * mean                            # biased variance
        scale = g_ref[...] * jax.lax.rsqrt(var + EPS)                  # (1, C)
        shift = bt_ref[...] - mean * scale                             # (1, C)
        ss = jnp.concatenate([scale, shift], axis=0)                   # (2, C)
        ss_l = jnp.dot(ss, selt, preferred_element_type=jnp.float32)   # (2, L)
        return a * ss_l[0:1, :] + ss_l[1:2, :]

    h = jnp.maximum(batchnorm(conv3x3(x, b1_ref), g1_ref, bt1_ref), 0.0)
    h = batchnorm(conv3x3(h, b2_ref), g2_ref, bt2_ref)
    out_ref[...] = jnp.maximum(h + x, 0.0)


def _lower_conv_taps(w_hwio, N, Wdim, C):
    """(3,3,Cin,Cout) HWIO weights -> (3*N*W*C, N*W*C) bf16 K-concatenated slab.

    Per kernel row dy, B[dy][(w+dx-1)*C + ci, w*C + co] = w_hwio[dy, dx, ci, co];
    out-of-range horizontal taps are absent (== zero padding in W).  The W*C
    block is replicated block-diagonally over the folded batch factor N, and
    the three dy blocks are concatenated along K."""
    eye_n = jnp.eye(N, dtype=jnp.float32)
    mats = []
    for dy in range(3):
        b = jnp.zeros((Wdim * C, Wdim * C), jnp.float32)
        for dx in range(3):
            band = jnp.eye(Wdim, Wdim, k=1 - dx, dtype=jnp.float32)
            b = b + jnp.kron(band, w_hwio[dy, dx].astype(jnp.float32))
        mats.append(jnp.kron(eye_n, b))            # block-diagonal over batch lanes
    return jnp.concatenate(mats, axis=0).astype(jnp.bfloat16)   # (3L, L)


def residual_block(x_nchw, params):
    """Pallas forward. x_nchw: (N, C, H, W) float32 -> (N, C, H, W) float32."""
    w1, b1, g1, bt1, w2, b2, g2, bt2 = params
    del b1, b2  # conv bias is exactly cancelled by training-mode BatchNorm
    N, C, H, W = x_nchw.shape
    L = N * W * C  # lane axis; 128 at the test shape -> fully lane-dense

    # Lane-dense layout: (H, N*W*C), batch folded into lanes.
    # TODO(synk): for large inputs accept/produce NHWC at the module boundary
    # to avoid these wrapper-side NCHW<->lane-layout transposes.
    x2 = jnp.transpose(x_nchw, (2, 0, 3, 1)).astype(jnp.float32).reshape(H, L)

    B1 = _lower_conv_taps(w1, N, W, C)
    B2 = _lower_conv_taps(w2, N, W, C)
    selt = jnp.tile(jnp.eye(C, dtype=jnp.float32), (1, N * W))    # (C, L)
    sel = selt.T                                                  # (L, C)

    g1r, bt1r, g2r, bt2r = (p.reshape(1, C).astype(jnp.float32)
                            for p in (g1, bt1, g2, bt2))

    args = (x2, B1, g1r, bt1r, B2, g2r, bt2r, sel, selt)

    def full_spec(a):
        nd = a.ndim
        return pl.BlockSpec(a.shape, lambda i, nd=nd: (0,) * nd)

    # TODO(synk): for large N*H*W, split H into row blocks on a leading
    # "parallel" grid axis (uses both v7x TensorCores) with a two-pass
    # cross-tile BatchNorm reduction, and band-tile the weight slab when W*C
    # grows (its (W*C)^2 footprint hits v7x's 64 MiB VMEM first); at these
    # shapes everything fits comfortably in VMEM in one step.
    out2 = pl.pallas_call(
        _residual_block_kernel,
        out_shape=jax.ShapeDtypeStruct((H, L), jnp.float32),
        grid=(1,),
        in_specs=[full_spec(a) for a in args],
        out_specs=pl.BlockSpec((H, L), lambda i: (0, 0)),
        compiler_params=pltpu.CompilerParams(
            dimension_semantics=("arbitrary",)),
    )(*args)

    return jnp.transpose(out2.reshape(H, N, W, C), (1, 3, 0, 2))


def residual_block_ref(x, params):
    """Pure-JAX reference (NCHW) mirroring the PyTorch forward."""
    w1, b1, g1, bt1, w2, b2, g2, bt2 = params

    def conv(x, w_hwio, b):
        w_oihw = jnp.transpose(w_hwio, (3, 2, 0, 1))
        y = jax.lax.conv_general_dilated(
            x, w_oihw, window_strides=(1, 1), padding=((1, 1), (1, 1)),
            dimension_numbers=("NCHW", "OIHW", "NCHW"))
        return y + b.reshape(1, -1, 1, 1)

    def bn(x, g, bt):
        mean = jnp.mean(x, axis=(0, 2, 3), keepdims=True)
        var = jnp.mean(jnp.square(x - mean), axis=(0, 2, 3), keepdims=True)
        return g.reshape(1, -1, 1, 1) * (x - mean) / jnp.sqrt(var + EPS) \
            + bt.reshape(1, -1, 1, 1)

    h = jax.nn.relu(bn(conv(x, w1, b1), g1, bt1))
    h = bn(conv(h, w2, b2), g2, bt2)
    return jax.nn.relu(h + x)


if __name__ == "__main__":
    # TODO(synk): BatchNorm running_mean/var buffer updates (training-side
    # state) are not modeled; only the forward output is reproduced.
    N, C, H, W = 2, 4, 16, 16
    key = jax.random.PRNGKey(0)
    ks = jax.random.split(key, 9)

    w1 = 0.2 * jax.random.normal(ks[0], (3, 3, C, C), jnp.float32)   # HWIO
    b1 = 0.1 * jax.random.normal(ks[1], (C,), jnp.float32)
    g1 = 1.0 + 0.1 * jax.random.normal(ks[2], (C,), jnp.float32)
    bt1 = 0.1 * jax.random.normal(ks[3], (C,), jnp.float32)
    w2 = 0.2 * jax.random.normal(ks[4], (3, 3, C, C), jnp.float32)   # HWIO
    b2 = 0.1 * jax.random.normal(ks[5], (C,), jnp.float32)
    g2 = 1.0 + 0.1 * jax.random.normal(ks[6], (C,), jnp.float32)
    bt2 = 0.1 * jax.random.normal(ks[7], (C,), jnp.float32)
    params = (w1, b1, g1, bt1, w2, b2, g2, bt2)

    x = jax.random.normal(ks[8], (N, C, H, W), jnp.float32)

    out = jax.block_until_ready(residual_block(x, params))
    ref = jax.block_until_ready(residual_block_ref(x, params))

    assert out.shape == (N, C, H, W) and out.dtype == jnp.float32
    if not jnp.allclose(out, ref, atol=2e-2, rtol=2e-2):
        max_err = float(jnp.max(jnp.abs(out - ref)))
        raise AssertionError(f"Pallas kernel mismatch vs reference, max_err={max_err}")

    print("KERNEL_OK")
</pallas_src>

<mosaic_0001>
module attributes {stable_mosaic.version = 11 : i64} {
  func.func @_residual_block_kernel(%arg0: i32, %arg1: memref<16x128xf32, #tpu.memory_space<vmem>>, %arg2: memref<384x128xbf16, #tpu.memory_space<vmem>>, %arg3: memref<1x4xf32, #tpu.memory_space<vmem>>, %arg4: memref<1x4xf32, #tpu.memory_space<vmem>>, %arg5: memref<384x128xbf16, #tpu.memory_space<vmem>>, %arg6: memref<1x4xf32, #tpu.memory_space<vmem>>, %arg7: memref<1x4xf32, #tpu.memory_space<vmem>>, %arg8: memref<128x4xf32, #tpu.memory_space<vmem>>, %arg9: memref<4x128xf32, #tpu.memory_space<vmem>>, %arg10: memref<16x128xf32, #tpu.memory_space<vmem>>) attributes {dimension_semantics = [#tpu.dimension_semantics<arbitrary>], iteration_bounds = array<i64: 1>, scalar_prefetch = 0 : i64, scratch_operands = 0 : i64, tpu.core_type = #tpu.core_type<tc>, window_params = [{pipeline_mode = #tpu.pipeline_mode<synchronous>, transform_indices = @transform_0, window_bounds = array<i64: 16, 128>}, {pipeline_mode = #tpu.pipeline_mode<synchronous>, transform_indices = @transform_1, window_bounds = array<i64: 384, 128>}, {pipeline_mode = #tpu.pipeline_mode<synchronous>, transform_indices = @transform_2, window_bounds = array<i64: 1, 4>}, {pipeline_mode = #tpu.pipeline_mode<synchronous>, transform_indices = @transform_3, window_bounds = array<i64: 1, 4>}, {pipeline_mode = #tpu.pipeline_mode<synchronous>, transform_indices = @transform_4, window_bounds = array<i64: 384, 128>}, {pipeline_mode = #tpu.pipeline_mode<synchronous>, transform_indices = @transform_5, window_bounds = array<i64: 1, 4>}, {pipeline_mode = #tpu.pipeline_mode<synchronous>, transform_indices = @transform_6, window_bounds = array<i64: 1, 4>}, {pipeline_mode = #tpu.pipeline_mode<synchronous>, transform_indices = @transform_7, window_bounds = array<i64: 128, 4>}, {pipeline_mode = #tpu.pipeline_mode<synchronous>, transform_indices = @transform_8, window_bounds = array<i64: 4, 128>}, {pipeline_mode = #tpu.pipeline_mode<synchronous>, transform_indices = @transform_9, window_bounds = array<i64: 16, 128>}]} {
    %c0 = arith.constant 0 : index
    %c0_0 = arith.constant 0 : index
    %0 = vector.load %arg1[%c0, %c0_0] : memref<16x128xf32, #tpu.memory_space<vmem>>, vector<16x128xf32>
    %c0_1 = arith.constant 0 : index
    %c0_2 = arith.constant 0 : index
    %1 = vector.load %arg8[%c0_1, %c0_2] : memref<128x4xf32, #tpu.memory_space<vmem>>, vector<128x4xf32>
    %c0_3 = arith.constant 0 : index
    %c0_4 = arith.constant 0 : index
    %2 = vector.load %arg9[%c0_3, %c0_4] : memref<4x128xf32, #tpu.memory_space<vmem>>, vector<4x128xf32>
    %cst = arith.constant 0.000000e+00 : f32
    %3 = vector.broadcast %cst : f32 to vector<1x128xf32>
    %4 = vector.extract_strided_slice %0 {offsets = [0, 0], sizes = [15, 128], strides = [1, 1]} : vector<16x128xf32> to vector<15x128xf32>
    %5 = tpu.concatenate %3, %4 in 0 : vector<1x128xf32>, vector<15x128xf32> -> vector<16x128xf32>
    %6 = vector.extract_strided_slice %0 {offsets = [1, 0], sizes = [15, 128], strides = [1, 1]} : vector<16x128xf32> to vector<15x128xf32>
    %7 = tpu.concatenate %6, %3 in 0 : vector<15x128xf32>, vector<1x128xf32> -> vector<16x128xf32>
    %8 = tpu.concatenate %5, %0, %7 in 1 : vector<16x128xf32>, vector<16x128xf32>, vector<16x128xf32> -> vector<16x384xf32>
    %9 = arith.truncf %8 : vector<16x384xf32> to vector<16x384xbf16>
    %c0_5 = arith.constant 0 : index
    %c0_6 = arith.constant 0 : index
    %10 = vector.load %arg2[%c0_5, %c0_6] : memref<384x128xbf16, #tpu.memory_space<vmem>>, vector<384x128xbf16>
    %cst_7 = arith.constant dense<0.000000e+00> : vector<16x128xf32>
    %11 = tpu.matmul %9, %10, %cst_7 {dimension_numbers = #tpu.dot_dimension_numbers<[1], [0], [0], [1], [0, 0, 1, 1], [], []>} : vector<16x384xbf16>, vector<384x128xbf16>, vector<16x128xf32> -> vector<16x128xf32>
    %cst_8 = arith.constant dense<0.000000e+00> : vector<128xf32>
    %12 = vector.multi_reduction <add>, %11, %cst_8 [0] : vector<16x128xf32> to vector<128xf32>
    %13 = vector.shape_cast %12 : vector<128xf32> to vector<1x128xf32>
    %14 = arith.mulf %11, %11 : vector<16x128xf32>
    %cst_9 = arith.constant dense<0.000000e+00> : vector<128xf32>
    %15 = vector.multi_reduction <add>, %14, %cst_9 [0] : vector<16x128xf32> to vector<128xf32>
    %16 = vector.shape_cast %15 : vector<128xf32> to vector<1x128xf32>
    %17 = tpu.concatenate %13, %16 in 0 : vector<1x128xf32>, vector<1x128xf32> -> vector<2x128xf32>
    %cst_10 = arith.constant dense<0.000000e+00> : vector<2x4xf32>
    %18 = tpu.matmul %17, %1, %cst_10 {dimension_numbers = #tpu.dot_dimension_numbers<[1], [0], [0], [1], [0, 0, 1, 1], [], []>} : vector<2x128xf32>, vector<128x4xf32>, vector<2x4xf32> -> vector<2x4xf32>
    %cst_11 = arith.constant 0.001953125 : f32
    %19 = vector.broadcast %cst_11 : f32 to vector<2x4xf32>
    %20 = arith.mulf %18, %19 : vector<2x4xf32>
    %21 = vector.extract_strided_slice %20 {offsets = [0, 0], sizes = [1, 4], strides = [1, 1]} : vector<2x4xf32> to vector<1x4xf32>
    %22 = vector.extract_strided_slice %20 {offsets = [1, 0], sizes = [1, 4], strides = [1, 1]} : vector<2x4xf32> to vector<1x4xf32>
    %23 = arith.mulf %21, %21 : vector<1x4xf32>
    %24 = arith.subf %22, %23 : vector<1x4xf32>
    %c0_12 = arith.constant 0 : index
    %c0_13 = arith.constant 0 : index
    %25 = vector.load %arg3[%c0_12, %c0_13] : memref<1x4xf32, #tpu.memory_space<vmem>>, vector<1x4xf32>
    %cst_14 = arith.constant 9.99999974E-6 : f32
    %26 = vector.broadcast %cst_14 : f32 to vector<1x4xf32>
    %27 = arith.addf %24, %26 : vector<1x4xf32>
    %28 = math.rsqrt %27 : vector<1x4xf32>
    %29 = arith.mulf %25, %28 : vector<1x4xf32>
    %c0_15 = arith.constant 0 : index
    %c0_16 = arith.constant 0 : index
    %30 = vector.load %arg4[%c0_15, %c0_16] : memref<1x4xf32, #tpu.memory_space<vmem>>, vector<1x4xf32>
    %31 = arith.mulf %21, %29 : vector<1x4xf32>
    %32 = arith.subf %30, %31 : vector<1x4xf32>
    %33 = tpu.concatenate %29, %32 in 0 : vector<1x4xf32>, vector<1x4xf32> -> vector<2x4xf32>
    %cst_17 = arith.constant dense<0.000000e+00> : vector<2x128xf32>
    %34 = tpu.matmul %33, %2, %cst_17 {dimension_numbers = #tpu.dot_dimension_numbers<[1], [0], [0], [1], [0, 0, 1, 1], [], []>} : vector<2x4xf32>, vector<4x128xf32>, vector<2x128xf32> -> vector<2x128xf32>
    %35 = vector.extract_strided_slice %34 {offsets = [0, 0], sizes = [1, 128], strides = [1, 1]} : vector<2x128xf32> to vector<1x128xf32>
    %36 = vector.broadcast %35 : vector<1x128xf32> to vector<16x128xf32>
    %37 = arith.mulf %11, %36 : vector<16x128xf32>
    %38 = vector.extract_strided_slice %34 {offsets = [1, 0], sizes = [1, 128], strides = [1, 1]} : vector<2x128xf32> to vector<1x128xf32>
    %39 = vector.broadcast %38 : vector<1x128xf32> to vector<16x128xf32>
    %40 = arith.addf %37, %39 : vector<16x128xf32>
    %cst_18 = arith.constant 0.000000e+00 : f32
    %41 = vector.broadcast %cst_18 : f32 to vector<16x128xf32>
    %42 = arith.maximumf %40, %41 : vector<16x128xf32>
    %cst_19 = arith.constant 0.000000e+00 : f32
    %43 = vector.broadcast %cst_19 : f32 to vector<1x128xf32>
    %44 = vector.extract_strided_slice %42 {offsets = [0, 0], sizes = [15, 128], strides = [1, 1]} : vector<16x128xf32> to vector<15x128xf32>
    %45 = tpu.concatenate %43, %44 in 0 : vector<1x128xf32>, vector<15x128xf32> -> vector<16x128xf32>
    %46 = vector.extract_strided_slice %42 {offsets = [1, 0], sizes = [15, 128], strides = [1, 1]} : vector<16x128xf32> to vector<15x128xf32>
    %47 = tpu.concatenate %46, %43 in 0 : vector<15x128xf32>, vector<1x128xf32> -> vector<16x128xf32>
    %48 = tpu.concatenate %45, %42, %47 in 1 : vector<16x128xf32>, vector<16x128xf32>, vector<16x128xf32> -> vector<16x384xf32>
    %49 = arith.truncf %48 : vector<16x384xf32> to vector<16x384xbf16>
    %c0_20 = arith.constant 0 : index
    %c0_21 = arith.constant 0 : index
    %50 = vector.load %arg5[%c0_20, %c0_21] : memref<384x128xbf16, #tpu.memory_space<vmem>>, vector<384x128xbf16>
    %cst_22 = arith.constant dense<0.000000e+00> : vector<16x128xf32>
    %51 = tpu.matmul %49, %50, %cst_22 {dimension_numbers = #tpu.dot_dimension_numbers<[1], [0], [0], [1], [0, 0, 1, 1], [], []>} : vector<16x384xbf16>, vector<384x128xbf16>, vector<16x128xf32> -> vector<16x128xf32>
    %cst_23 = arith.constant dense<0.000000e+00> : vector<128xf32>
    %52 = vector.multi_reduction <add>, %51, %cst_23 [0] : vector<16x128xf32> to vector<128xf32>
    %53 = vector.shape_cast %52 : vector<128xf32> to vector<1x128xf32>
    %54 = arith.mulf %51, %51 : vector<16x128xf32>
    %cst_24 = arith.constant dense<0.000000e+00> : vector<128xf32>
    %55 = vector.multi_reduction <add>, %54, %cst_24 [0] : vector<16x128xf32> to vector<128xf32>
    %56 = vector.shape_cast %55 : vector<128xf32> to vector<1x128xf32>
    %57 = tpu.concatenate %53, %56 in 0 : vector<1x128xf32>, vector<1x128xf32> -> vector<2x128xf32>
    %cst_25 = arith.constant dense<0.000000e+00> : vector<2x4xf32>
    %58 = tpu.matmul %57, %1, %cst_25 {dimension_numbers = #tpu.dot_dimension_numbers<[1], [0], [0], [1], [0, 0, 1, 1], [], []>} : vector<2x128xf32>, vector<128x4xf32>, vector<2x4xf32> -> vector<2x4xf32>
    %cst_26 = arith.constant 0.001953125 : f32
    %59 = vector.broadcast %cst_26 : f32 to vector<2x4xf32>
    %60 = arith.mulf %58, %59 : vector<2x4xf32>
    %61 = vector.extract_strided_slice %60 {offsets = [0, 0], sizes = [1, 4], strides = [1, 1]} : vector<2x4xf32> to vector<1x4xf32>
    %62 = vector.extract_strided_slice %60 {offsets = [1, 0], sizes = [1, 4], strides = [1, 1]} : vector<2x4xf32> to vector<1x4xf32>
    %63 = arith.mulf %61, %61 : vector<1x4xf32>
    %64 = arith.subf %62, %63 : vector<1x4xf32>
    %c0_27 = arith.constant 0 : index
    %c0_28 = arith.constant 0 : index
    %65 = vector.load %arg6[%c0_27, %c0_28] : memref<1x4xf32, #tpu.memory_space<vmem>>, vector<1x4xf32>
    %cst_29 = arith.constant 9.99999974E-6 : f32
    %66 = vector.broadcast %cst_29 : f32 to vector<1x4xf32>
    %67 = arith.addf %64, %66 : vector<1x4xf32>
    %68 = math.rsqrt %67 : vector<1x4xf32>
    %69 = arith.mulf %65, %68 : vector<1x4xf32>
    %c0_30 = arith.constant 0 : index
    %c0_31 = arith.constant 0 : index
    %70 = vector.load %arg7[%c0_30, %c0_31] : memref<1x4xf32, #tpu.memory_space<vmem>>, vector<1x4xf32>
    %71 = arith.mulf %61, %69 : vector<1x4xf32>
    %72 = arith.subf %70, %71 : vector<1x4xf32>
    %73 = tpu.concatenate %69, %72 in 0 : vector<1x4xf32>, vector<1x4xf32> -> vector<2x4xf32>
    %cst_32 = arith.constant dense<0.000000e+00> : vector<2x128xf32>
    %74 = tpu.matmul %73, %2, %cst_32 {dimension_numbers = #tpu.dot_dimension_numbers<[1], [0], [0], [1], [0, 0, 1, 1], [], []>} : vector<2x4xf32>, vector<4x128xf32>, vector<2x128xf32> -> vector<2x128xf32>
    %75 = vector.extract_strided_slice %74 {offsets = [0, 0], sizes = [1, 128], strides = [1, 1]} : vector<2x128xf32> to vector<1x128xf32>
    %76 = vector.broadcast %75 : vector<1x128xf32> to vector<16x128xf32>
    %77 = arith.mulf %51, %76 : vector<16x128xf32>
    %78 = vector.extract_strided_slice %74 {offsets = [1, 0], sizes = [1, 128], strides = [1, 1]} : vector<2x128xf32> to vector<1x128xf32>
    %79 = vector.broadcast %78 : vector<1x128xf32> to vector<16x128xf32>
    %80 = arith.addf %77, %79 : vector<16x128xf32>
    %81 = arith.addf %80, %0 : vector<16x128xf32>
    %cst_33 = arith.constant 0.000000e+00 : f32
    %82 = vector.broadcast %cst_33 : f32 to vector<16x128xf32>
    %83 = arith.maximumf %81, %82 : vector<16x128xf32>
    %c0_34 = arith.constant 0 : index
    %c0_35 = arith.constant 0 : index
    %84 = vector.load %arg10[%c0_34, %c0_35] : memref<16x128xf32, #tpu.memory_space<vmem>>, vector<16x128xf32>
    tpu.vector_store %arg10[%c0_34, %c0_35], %83 {strides = array<i32>} : memref<16x128xf32, #tpu.memory_space<vmem>>, vector<16x128xf32>,
    return
  }
  func.func @transform_0(%arg0: i32) -> (i32, i32) {
    %c0_i32 = arith.constant 0 : i32
    %c0_i32_0 = arith.constant 0 : i32
    %c0_i32_1 = arith.constant 0 : i32
    return %c0_i32, %c0_i32_0 : i32, i32
  }
  func.func @transform_1(%arg0: i32) -> (i32, i32) {
    %c0_i32 = arith.constant 0 : i32
    %c0_i32_0 = arith.constant 0 : i32
    %c0_i32_1 = arith.constant 0 : i32
    return %c0_i32, %c0_i32_0 : i32, i32
  }
  func.func @transform_2(%arg0: i32) -> (i32, i32) {
    %c0_i32 = arith.constant 0 : i32
    %c0_i32_0 = arith.constant 0 : i32
    %c0_i32_1 = arith.constant 0 : i32
    return %c0_i32, %c0_i32_0 : i32, i32
  }
  func.func @transform_3(%arg0: i32) -> (i32, i32) {
    %c0_i32 = arith.constant 0 : i32
    %c0_i32_0 = arith.constant 0 : i32
    %c0_i32_1 = arith.constant 0 : i32
    return %c0_i32, %c0_i32_0 : i32, i32
  }
  func.func @transform_4(%arg0: i32) -> (i32, i32) {
    %c0_i32 = arith.constant 0 : i32
    %c0_i32_0 = arith.constant 0 : i32
    %c0_i32_1 = arith.constant 0 : i32
    return %c0_i32, %c0_i32_0 : i32, i32
  }
  func.func @transform_5(%arg0: i32) -> (i32, i32) {
    %c0_i32 = arith.constant 0 : i32
    %c0_i32_0 = arith.constant 0 : i32
    %c0_i32_1 = arith.constant 0 : i32
    return %c0_i32, %c0_i32_0 : i32, i32
  }
  func.func @transform_6(%arg0: i32) -> (i32, i32) {
    %c0_i32 = arith.constant 0 : i32
    %c0_i32_0 = arith.constant 0 : i32
    %c0_i32_1 = arith.constant 0 : i32
    return %c0_i32, %c0_i32_0 : i32, i32
  }
  func.func @transform_7(%arg0: i32) -> (i32, i32) {
    %c0_i32 = arith.constant 0 : i32
    %c0_i32_0 = arith.constant 0 : i32
    %c0_i32_1 = arith.constant 0 : i32
    return %c0_i32, %c0_i32_0 : i32, i32
  }
  func.func @transform_8(%arg0: i32) -> (i32, i32) {
    %c0_i32 = arith.constant 0 : i32
    %c0_i32_0 = arith.constant 0 : i32
    %c0_i32_1 = arith.constant 0 : i32
    return %c0_i32, %c0_i32_0 : i32, i32
  }
  func.func @transform_9(%arg0: i32) -> (i32, i32) {
    %c0_i32 = arith.constant 0 : i32
    %c0_i32_0 = arith.constant 0 : i32
    %c0_i32_1 = arith.constant 0 : i32
    return %c0_i32, %c0_i32_0 : i32, i32
  }
}

</mosaic_0001>

<bundles_post_ra>
// kernel: tpu_custom_call.1
= control target key start
LH: loop header
LB: loop body
LE: loop exit
PB: predicated region body
PF: predicated region fallthrough
CT: control target
= control target key end

     0   :  { %14 = vsyncpa [#allocation3], 0  ;;  %s1879_s0 = inlined_call_operand.vmem [shape: f32[16,128], index: 0, kind: input, shape index: {}]   ;;  %s1880_s1 = inlined_call_operand.hbm [shape: bf16[384,128], index: 1, kind: input, shape index: {}]   ;;  %s1881_s2 = inlined_call_operand.vmem [shape: f32[1,4], index: 2, kind: input, shape index: {}]   ;;  %s1882_s3 = inlined_call_operand.vmem [shape: f32[1,4], index: 3, kind: input, shape index: {}]   ;;  %s1883_s4 = inlined_call_operand.hbm [shape: bf16[384,128], index: 4, kind: input, shape index: {}]   ;;  %s1884_s5 = inlined_call_operand.vmem [shape: f32[1,4], index: 5, kind: input, shape index: {}]   ;;  %s1885_s6 = inlined_call_operand.vmem [shape: f32[1,4], index: 6, kind: input, shape index: {}]   ;;  %s1886_s7 = inlined_call_operand.vmem [shape: f32[128,4], index: 7, kind: input, shape index: {}]   ;;  %s1887_s8 = inlined_call_operand.vmem [shape: f32[4,128], index: 8, kind: input, shape index: {}]   ;;  %s1888_s9 = inlined_call_operand.hbm [shape: f32[16,128], index: 9, kind: output, shape index: {}]  }
   0x1   :  { %15 = vsyncpa [#allocation6], 0 }
   0x2   :  { %16 = vsyncpa [#allocation4], 0  ;;  %s1529_s30 = smov [#allocation2]  }
   0x3   :  { %s24_s10 = sshll.u32 %s1529_s30, 4  ;;  %s25_s10 = int_to_ptr.vmem [resolvable:$true] %s24_s10 }
   0x4   :  { %s1471_s11 = scalar_lea.vmem %s25_s10, 3072  ;;  %p1476_p1 = scmp.lt.s32.totalorder %s25_s10, %s25_s10 }
   0x5   :  { %p1472_p0 = scmp.ne.s32.totalorder %s25_s10, %s1471_s11  ;;  %p1477_p2 = scmp.lt.s32.totalorder %s1471_s11, %s1471_s11 }
   0x7   :  { %p1478_p3 = por %p1477_p2, %p1476_p1 }
   0x9   :  { %p1479_p4 = pnand %p1478_p3, %p1472_p0 }
   0xb   :  { %1482 = shalt.err (!%p1479_p4)
}
   0xc   :  { %s1530_s12 = smov 64   ;;  %s1531_s13 = smov 4  }
   0xd   :  { %30 = dma.hbm_to_vmem [thread:$0]  %s1880_s1, 3072, %s25_s10, [#allocation3], %s1530_s12, %s1530_s12, %s1531_s13  }
   0xe   :  { %s1532_s16 = smov [#allocation5]  }
   0xf   :  { %s40_s17 = sshll.u32 %s1532_s16, 4  ;;  %s41_s17 = int_to_ptr.vmem [resolvable:$true] %s40_s17 }
  0x10   :  { %s1491_s18 = scalar_lea.vmem %s41_s17, 3072  ;;  %p1496_p6 = scmp.lt.s32.totalorder %s41_s17, %s41_s17 }
  0x11   :  { %p1492_p5 = scmp.ne.s32.totalorder %s41_s17, %s1491_s18  ;;  %p1497_p7 = scmp.lt.s32.totalorder %s1491_s18, %s1491_s18 }
  0x13   :  { %p1498_p8 = por %p1497_p7, %p1496_p6 }
  0x15   :  { %p1499_p9 = pnand %p1498_p8, %p1492_p5 }
  0x17   :  { %1502 = shalt.err (!%p1499_p9)
}
  0x18   :  { %46 = dma.hbm_to_vmem [thread:$0]  %s1883_s4, 3072, %s41_s17, [#allocation6], %s1530_s12, %s1530_s12, %s1531_s13  }
  0x19   :  { %1523 = dma.done.wait [#allocation3], 3072  }
  0x1a   :  { %1524 = vsyncadd [#allocation3], 4294964224 }
  0x1b   :  { %1525 = dma.done.wait [#allocation6], 3072  }
  0x1c   :  { %1526 = vsyncadd [#allocation6], 4294964224  ;;  %v1533_v0 = vmov 0.0   ;;  %vm1534_vm0 = vmmov 0   ;;  %v1411_v1 = vld [vmem:[#allocation2 + $0x78] sm:$0xff]   ;;  %v1414_v4 = vld [vmem:[#allocation2 + $0x70] sm:$0xff]  }
  0x1d   :  { %1280 = vmatprep.subr.bf16.mxu1 %v1533_v0  ;;  %1296 = vmatprep.mubr.msk.bf16.mxu1 %vm1534_vm0, %v1533_v0  ;;  %v1412_v2 = vld [vmem:[#allocation2 + $0xb8] sm:$0xff]   ;;  %v1415_v5 = vld [vmem:[#allocation2 + $0xb0] sm:$0xff]   ;;  %v1417_v7 = vld [vmem:[#allocation2 + $0x68] sm:$0xff]   ;;  %vm83_vm1 = vcmask 1040384   ;;  %vm90_vm3 = vcmask 1046528   ;;  %vm1535_vm4 = vmmov 1  }
  0x1e   :  { %1180 = vmatprep.subr.bf16.mxu0 %v1411_v1  ;;  %v1413_v3 = vld [vmem:[#allocation2 + $0x38] sm:$0xff]   ;;  %1281 = vmatpush3.bf16.msra.mxu1 %v1412_v2  ;;  %v1416_v6 = vld [vmem:[#allocation2 + $0x30] sm:$0xff]   ;;  %v1418_v8 = vld [vmem:[#allocation2 + $0xa8] sm:$0xff]   ;;  %vm502_vm7 = vcmask 1043456   ;;  %vm498_vm8 = vcmask 31744  }
  0x1f   :  { %1181 = vmatpush3.bf16.msra.mxu0 %v1413_v3  ;;  %1282 = vmatprep.subr.bf16.mxu1 %v1533_v0  ;;  %v1419_v9 = vld [vmem:[#allocation2 + $0x28] sm:$0xff]   ;;  %v1420_v10 = vld [vmem:[#allocation2 + $0x60] sm:$0xff]   ;;  %v1423_v13 = vld [vmem:[#allocation2 + $0x58] sm:$0xff]  }
  0x20   :  { %1182 = vmatprep.subr.bf16.mxu0 %v1414_v4  ;;  %v1421_v11 = vld [vmem:[#allocation2 + $0xa0] sm:$0xff]   ;;  %v1424_v14 = vld [vmem:[#allocation2 + $0x98] sm:$0xff]   ;;  %v1426_v16 = vld [vmem:[#allocation2 + $0x50] sm:$0xff]  }
  0x21   :  { %v1422_v12 = vld [vmem:[#allocation2 + $0x20] sm:$0xff]   ;;  %v1425_v15 = vld [vmem:[#allocation2 + $0x18] sm:$0xff]   ;;  %vm1604_vm2 = vmneg %vm83_vm1 }
  0x22   :  { %1283 = vmatpush3.bf16.msra.mxu1 %v1415_v5  ;;  %v1427_v18 = vld [vmem:[#allocation2 + $0x90] sm:$0xff]   ;;  %v1429_v20 = vld [vmem:[#allocation2 + $0x48] sm:$0xff]   ;;  %vm1610_vm5 = vmpackc.low %vm90_vm3, %vm1535_vm4 }
  0x23   :  { %1183 = vmatpush3.bf16.msra.mxu0 %v1416_v6  ;;  %1284 = vmatprep.subr.bf16.mxu1 %v1533_v0  ;;  %v1428_v19 = vld [vmem:[#allocation2 + $0x10] sm:$0xff]   ;;  %v1430_v21 = vld [vmem:[#allocation2 + $0x88] sm:$0xff]   ;;  %v1432_v24 = vld [vmem:[#allocation2 + $0x40] sm:$0xff]  }
  0x24   :  { %1184 = vmatprep.subr.bf16.mxu0 %v1417_v7  ;;  %v1431_v22 = vld [vmem:[#allocation2 + $0x8] sm:$0xff]   ;;  %v1618_v25 = vld [vmem:[%s1879_s0] sm:$0xff]  ;;  %vm1631_vm6 = vmpackc.low %vm1535_vm4, %vm1604_vm2 }
  0x25   :  { %v1623_v26 = vld [vmem:[%s1879_s0 + $0x8] sm:$0xff]  ;;  %v1433_v27 = vld [vmem:[#allocation2 + $0x80] sm:$0xff]   ;;  %v84_v28 = vrot.slane %v1618_v25, 7  ;;  %v91_v30 = vrot.slane %v1618_v25, 1  ;;  %v1643_v39 = vld [vmem:[%s1886_s7 + $0x78] sm:$0xff] }
  0x26   :  { %1285 = vmatpush3.bf16.msra.mxu1 %v1418_v8  ;;  %v85_v29 = vrot.slane %v1623_v26, 7  ;;  %v92_v31 = vrot.slane %v1623_v26, 1  ;;  %v1434_v33 = vld [vmem:[#allocation2] sm:$0xff]   ;;  %v98_v34 = vpack.c.bf16 %v1623_v26, %v1618_v25  ;;  %v1660_v40 = vld [vmem:[%s1886_s7 + $0x70] sm:$0xff]  ;;  %v1667_v41 = vld [vmem:[%s1886_s7 + $0x68] sm:$0xff] }
  0x27   :  { %1185 = vmatpush3.bf16.msra.mxu0 %v1419_v9  ;;  %1286 = vmatprep.subr.bf16.mxu1 %v1533_v0  ;;  %v1674_v42 = vld [vmem:[%s1886_s7 + $0x60] sm:$0xff]  ;;  %v1681_v43 = vld [vmem:[%s1886_s7 + $0x58] sm:$0xff]  ;;  %v1688_v44 = vld [vmem:[%s1886_s7 + $0x50] sm:$0xff] }
  0x28   :  { %1186 = vmatprep.subr.bf16.mxu0 %v1420_v10  ;;  %v93_v35 = vsel %vm90_vm3, %v91_v30, %v92_v31  ;;  %v86_v36 = vsel %vm83_vm1, %v84_v28, %v85_v29  ;;  %324 = vmatprep.mubr.bf16.mxu0 %v98_v34  ;;  %v1695_v45 = vld [vmem:[%s1886_s7 + $0x48] sm:$0xff]  ;;  %v1702_v46 = vld [vmem:[%s1886_s7 + $0x40] sm:$0xff]  ;;  %v1709_v47 = vld [vmem:[%s1886_s7 + $0x38] sm:$0xff] }
  0x29   :  { %v1143_v37 = vpack.c.bf16 %v92_v31, %v93_v35  ;;  %v1140_v38 = vpack.c.bf16 %v86_v36, %v84_v28  ;;  %v1716_v48 = vld [vmem:[%s1886_s7 + $0x30] sm:$0xff]  ;;  %v1723_v49 = vld [vmem:[%s1886_s7 + $0x28] sm:$0xff]  ;;  %v1729_v50 = vld [vmem:[%s1886_s7 + $0x20] sm:$0xff] }
  0x2a   :  { %1287 = vmatpush3.bf16.msra.mxu1 %v1421_v11  ;;  %v1735_v51 = vld [vmem:[%s1886_s7 + $0x18] sm:$0xff]  ;;  %v1742_v52 = vld [vmem:[%s1886_s7 + $0x10] sm:$0xff]  ;;  %v1749_v53 = vld [vmem:[%s1886_s7 + $0x8] sm:$0xff] }
  0x2b   :  { %1187 = vmatpush3.bf16.msra.mxu0 %v1422_v12  ;;  %1288 = vmatprep.subr.bf16.mxu1 %v1533_v0  ;;  %v1756_v54 = vld [vmem:[%s1886_s7] sm:$0xff]  ;;  %v1443_v28 = vld [vmem:[#allocation5 + $0xa8] sm:$0xff]   ;;  %v1449_v30 = vld [vmem:[#allocation5 + $0x98] sm:$0xff]  }
  0x2c   :  { %1188 = vmatprep.subr.bf16.mxu0 %v1423_v13  ;;  %v1446_v29 = vld [vmem:[#allocation5 + $0xa0] sm:$0xff]  }
  0x2e   :  { %1289 = vmatpush3.bf16.msra.mxu1 %v1424_v14 }
  0x2f   :  { %1189 = vmatpush3.bf16.msra.mxu0 %v1425_v15  ;;  %1290 = vmatprep.subr.bf16.mxu1 %v1533_v0 }
  0x30   :  { %1190 = vmatprep.subr.bf16.mxu0 %v1426_v16 }
  0x32   :  { %1291 = vmatpush3.bf16.msra.mxu1 %v1427_v18 }
  0x33   :  { %1191 = vmatpush3.bf16.msra.mxu0 %v1428_v19  ;;  %1292 = vmatprep.subr.bf16.mxu1 %v1533_v0 }
  0x34   :  { %1192 = vmatprep.subr.bf16.mxu0 %v1429_v20 }
  0x36   :  { %1293 = vmatpush3.bf16.msra.mxu1 %v1430_v21  ;;  %v1778_v21 = vld [vmem:[%s1887_s8] sm:$0xf] }
  0x37   :  { %1193 = vmatpush3.bf16.msra.mxu0 %v1431_v22  ;;  %1294 = vmatprep.subr.bf16.mxu1 %v1533_v0  ;;  %v1435_v22 = vld [vmem:[#allocation5 + $0x78] sm:$0xff]  }
  0x38   :  { %1194 = vmatprep.subr.bf16.mxu0 %v1432_v24  ;;  %v1437_v24 = vld [vmem:[#allocation5 + $0xb8] sm:$0xff]  }
  0x3a   :  { %1295 = vmatpush3.bf16.msra.mxu1 %v1433_v27  ;;  %v1440_v27 = vld [vmem:[#allocation5 + $0xb0] sm:$0xff]  }
  0x3b   :  { %1195 = vmatpush3.bf16.msra.mxu0 %v1434_v33  ;;  %1335 = vmatprep.subr.mxu1 %v1533_v0 }
  0x3c   :  { %1300 = vmatprep.subr.mxu0 %v1533_v0 }
  0x3d   :  { %1297 = vmatmul.mubr.msk.bf16.vlgmr.msra.gmra.mxu1 %vm1610_vm5, %v1143_v37 }
  0x3e   :  { %1141 = vmatmul.mubr.msk.bf16.vlgmr.msra.gmra.mxu0 %vm1631_vm6, %v1140_v38  ;;  %1337 = vmatprep.mubr.msk.f32.mxu1 %vm1534_vm0, %v1533_v0 }
  0x3f   :  { %1301 = vmatpush3.msra.mxu0 %v1643_v39  ;;  %1332 = vmatprep.mubr.msk.f32.mxu0 %vm1534_vm0, %v1533_v0 }
  0x40   :  { %1302 = vmatprep.subr.mxu0 %v1533_v0  ;;  %1336 = vmatpush3.msk.msra.mxu1 %vm502_vm7, %v1778_v21 }
  0x41   :  { %1303 = vmatpush3.msra.mxu0 %v1660_v40  ;;  %1230 = vmatprep.subr.bf16.mxu1 %v1435_v22  ;;  %v1450_v22 = vld [vmem:[#allocation5 + $0x50] sm:$0xff]  }
  0x42   :  { %1304 = vmatprep.subr.mxu0 %v1533_v0 }
  0x43   :  { %1305 = vmatpush3.msra.mxu0 %v1667_v41 }
  0x44   :  { %1306 = vmatprep.subr.mxu0 %v1533_v0 }
  0x45   :  { %1307 = vmatpush3.msra.mxu0 %v1674_v42 }
  0x46   :  { %1308 = vmatprep.subr.mxu0 %v1533_v0 }
  0x47   :  { %1309 = vmatpush3.msra.mxu0 %v1681_v43 }
  0x48   :  { %1310 = vmatprep.subr.mxu0 %v1533_v0 }
  0x49   :  { %1311 = vmatpush3.msra.mxu0 %v1688_v44 }
  0x4a   :  { %1312 = vmatprep.subr.mxu0 %v1533_v0 }
  0x4b   :  { %1313 = vmatpush3.msra.mxu0 %v1695_v45 }
  0x4c   :  { %1314 = vmatprep.subr.mxu0 %v1533_v0 }
  0x4d   :  { %1315 = vmatpush3.msra.mxu0 %v1702_v46 }
  0x4e   :  { %1316 = vmatprep.subr.mxu0 %v1533_v0 }
  0x4f   :  { %1317 = vmatpush3.msra.mxu0 %v1709_v47 }
  0x50   :  { %1318 = vmatprep.subr.mxu0 %v1533_v0 }
  0x51   :  { %1319 = vmatpush3.msra.mxu0 %v1716_v48 }
  0x52   :  { %1320 = vmatprep.subr.mxu0 %v1533_v0 }
  0x53   :  { %1321 = vmatpush3.msra.mxu0 %v1723_v49 }
  0x54   :  { %1322 = vmatprep.subr.mxu0 %v1533_v0 }
  0x55   :  { %1323 = vmatpush3.msra.mxu0 %v1729_v50 }
  0x56   :  { %1324 = vmatprep.subr.mxu0 %v1533_v0 }
  0x57   :  { %1325 = vmatpush3.msra.mxu0 %v1735_v51 }
  0x58   :  { %1326 = vmatprep.subr.mxu0 %v1533_v0 }
  0x59   :  { %1327 = vmatpush3.msra.mxu0 %v1742_v52 }
  0x5a   :  { %1328 = vmatprep.subr.mxu0 %v1533_v0 }
  0x5b   :  { %1329 = vmatpush3.msra.mxu0 %v1749_v53 }
  0x5c   :  { %1330 = vmatprep.subr.mxu0 %v1533_v0 }
  0x5d   :  { %1331 = vmatpush3.msra.mxu0 %v1756_v54 }
  0x5e   :  { %1340 = vmatprep.subr.bf16.mxu0 %v1533_v0 }
  0xfd   :  { %v367_v55 = vpop.f32.mrf.mxu1 }
  0xfe   :  { %v1196_v56 = vpop.f32.mrf.mxu0 }
  0xff   :  { %v1298_v57 = vpop.f32.mrf.mxu1 }
 0x100   :  { %v1197_v58 = vpop.f32.mrf.mxu0  ;;  %v474_v57 = vlaneseq }
 0x101   :  { %v1198_v59 = vadd.f32 %v1197_v58, %v1196_v56  ;;  %v370_v60 = vpop.f32.mrf.mxu1 }
 0x102   :  { %v1199_v61 = vpop.f32.mrf.mxu0 }
 0x103   :  { %v1299_v62 = vpop.f32.mrf.mxu1  ;;  %v1762_v1 = vadd.f32 %v1198_v59, %v367_v55  ;;  %v1536_v55 = vmov 1966171168   ;;  %v1787_v59 = vshrl.u32 %v474_v57, 7 }
 0x104   :  { %v1200_v63 = vpop.f32.mrf.mxu0  ;;  %v472_v56 = vunpack.c.l.s4 %v1536_v55 }
 0x105   :  { %v1201_v2 = vadd.f32 %v1200_v63, %v1199_v61  ;;  %v381_v4 = vmul.f32 %v1762_v1, %v1762_v1 }
 0x106   :  { %v473_v58 = vunpack.c.0.s8 %v472_v56 }
 0x107   :  { %v1764_v3 = vadd.f32 %v1201_v2, %v370_v60  ;;  %v467_v2 = vld [vmem:[%s1881_s2] sm:$0x1] }
 0x108   :  { %v1790_v60 = vsub.s32 %v473_v58, %v1787_v59 }
 0x109   :  { %v374_v5 = vadd.f32 %v1764_v3, %v1762_v1  ;;  %v382_v6 = vmul.f32 %v1764_v3, %v1764_v3 }
 0x10b   :  { %v375_v7 = vrot.slane %v374_v5, 4  ;;  %v383_v8 = vadd.f32 %v382_v6, %v381_v4  ;;  %v488_v6 = vld [vmem:[%s1882_s3] sm:$0x1] }
 0x10d   :  { %v376_v9 = vadd.f32 %v375_v7, %v374_v5  ;;  %v384_v10 = vrot.slane %v383_v8, 4 }
 0x10f   :  { %v377_v11 = vrot.slane %v376_v9, 2  ;;  %v385_v12 = vadd.f32 %v384_v10, %v383_v8  ;;  %v1801_v8 = vsub.s32 0, %v1787_v59 }
 0x111   :  { %v378_v13 = vadd.f32 %v377_v11, %v376_v9  ;;  %v386_v14 = vrot.slane %v385_v12, 2  ;;  %v1436_v11 = vld [vmem:[#allocation5 + $0x38] sm:$0xff]  }
 0x113   :  { %v379_v15 = vrot.slane %v378_v13, 1  ;;  %v387_v16 = vadd.f32 %v386_v14, %v385_v12  ;;  %v1438_v12 = vld [vmem:[#allocation5 + $0x70] sm:$0xff]  }
 0x114   :  { %v1439_v14 = vld [vmem:[#allocation5 + $0x30] sm:$0xff]  }
 0x115   :  { %v388_v17 = vrot.slane %v387_v16, 1  ;;  %v380_v18 = vadd.f32 %v379_v15, %v378_v13  ;;  %v1441_v15 = vld [vmem:[#allocation5 + $0x68] sm:$0xff]  }
 0x117   :  { %v389_v19 = vadd.f32 %v388_v17, %v387_v16  ;;  %v1442_v16 = vld [vmem:[#allocation5 + $0x28] sm:$0xff]   ;;  %v1444_v17 = vld [vmem:[#allocation5 + $0x60] sm:$0xff]  }
 0x119   :  { %v390_v20 = vsel %vm83_vm1, %v380_v18, %v389_v19  ;;  %v1445_v18 = vld [vmem:[#allocation5 + $0x20] sm:$0xff]   ;;  %v1447_v19 = vld [vmem:[#allocation5 + $0x58] sm:$0xff]  }
 0x11a   :  { %1333 = vmatmul.mubr.f32.vlgmr.msra.gmra.mxu0 %v390_v20  ;;  %v1448_v20 = vld [vmem:[#allocation5 + $0x18] sm:$0xff]  }
 0x11b   :  { %1356 = vmatprep.mubr.msk.bf16.mxu0 %vm1534_vm0, %v1533_v0  ;;  %1341 = vmatpush3.bf16.msra.mxu0 %v1437_v24  ;;  %v1451_v24 = vld [vmem:[#allocation5 + $0x10] sm:$0xff]  }
 0x11c   :  { %1342 = vmatprep.subr.bf16.mxu0 %v1533_v0 }
 0x11f   :  { %1343 = vmatpush3.bf16.msra.mxu0 %v1440_v27  ;;  %v1452_v27 = vld [vmem:[#allocation5 + $0x90] sm:$0xff]  }
 0x120   :  { %1344 = vmatprep.subr.bf16.mxu0 %v1533_v0 }
 0x123   :  { %1345 = vmatpush3.bf16.msra.mxu0 %v1443_v28  ;;  %v1453_v28 = vld [vmem:[#allocation5 + $0x48] sm:$0xff]  }
 0x124   :  { %1346 = vmatprep.subr.bf16.mxu0 %v1533_v0 }
 0x127   :  { %1347 = vmatpush3.bf16.msra.mxu0 %v1446_v29  ;;  %v1454_v29 = vld [vmem:[#allocation5 + $0x8] sm:$0xff]  }
 0x128   :  { %1348 = vmatprep.subr.bf16.mxu0 %v1533_v0 }
 0x12b   :  { %1349 = vmatpush3.bf16.msra.mxu0 %v1449_v30  ;;  %v1455_v30 = vld [vmem:[#allocation5 + $0x88] sm:$0xff]  }
 0x12c   :  { %1350 = vmatprep.subr.bf16.mxu0 %v1533_v0 }
 0x12f   :  { %1351 = vmatpush3.bf16.msra.mxu0 %v1452_v27 }
 0x130   :  { %1352 = vmatprep.subr.bf16.mxu0 %v1533_v0 }
 0x133   :  { %1353 = vmatpush3.bf16.msra.mxu0 %v1455_v30 }
 0x134   :  { %1354 = vmatprep.subr.bf16.mxu0 %v1533_v0 }
 0x1da   :  { %v457_v31 = vpop.f32.mrf.mxu0 }
 0x1db   :  { %v461_v33 = vmul.f32 0.001953125, %v457_v31  ;;  %v1456_v31 = vld [vmem:[#allocation5 + $0x40] sm:$0xff]  }
 0x1dc   :  { %v1334_v34 = vpop.f32.mrf.mxu0 }
 0x1dd   :  { %v462_v35 = vmul.f32 %v461_v33, %v461_v33  ;;  %v1458_v34 = vld [vmem:[#allocation5 + $0x80] sm:$0xff]  }
 0x1de   :  { %1355 = vmatpush3.bf16.msra.mxu0 %v1458_v34 }
 0x1df   :  { %v464_v36 = vrot.slane %v462_v35, 7  ;;  %1395 = vmatprep.subr.mxu0 %v1533_v0  ;;  %v584_v35 = vsub.s32 1, %v1787_v59 }
 0x1e1   :  { %v466_v37 = vsub.f32 %v461_v33, %v464_v36 }
 0x1e3   :  { %v468_v38 = vadd.f32 1e-05, %v466_v37 }
 0x1e5   :  { %1459 = vrsqrt.f32 %v468_v38 }
 0x1f2   :  { %v1460_v61 = vpop.eup %1459 }
 0x1f3   :  { %v477_v62 = vrot.slane %v1460_v61, %v1790_v60 }
 0x1f5   :  { %v478_v63 = vcombine.high %v477_v62, %v477_v62 }
 0x1f7   :  { %v485_v4 = vrot.slane %v478_v63, %v1790_v60 }
 0x1f9   :  { %v487_v5 = vmul.f32 %v485_v4, %v467_v2 }
 0x1fb   :  { %v489_v7 = vmul.f32 %v487_v5, %v461_v33  ;;  %v1457_v33 = vld [vmem:[#allocation5] sm:$0xff]  }
 0x1fd   :  { %v490_v9 = vsub.f32 %v488_v6, %v489_v7 }
 0x1ff   :  { %v495_v10 = vrot.slane %v490_v9, %v1801_v8 }
 0x201   :  { %v497_v13 = vsel %vm83_vm1, %v487_v5, %v495_v10 }
 0x202   :  { %1338 = vmatmul.mubr.msk.f32.vlgmr.msra.gmra.mxu1 %vm498_vm8, %v497_v13 }
 0x203   :  { %1231 = vmatpush3.bf16.msra.mxu1 %v1436_v11 }
 0x204   :  { %1232 = vmatprep.subr.bf16.mxu1 %v1438_v12 }
 0x207   :  { %1233 = vmatpush3.bf16.msra.mxu1 %v1439_v14 }
 0x208   :  { %1234 = vmatprep.subr.bf16.mxu1 %v1441_v15 }
 0x20b   :  { %1235 = vmatpush3.bf16.msra.mxu1 %v1442_v16 }
 0x20c   :  { %1236 = vmatprep.subr.bf16.mxu1 %v1444_v17 }
 0x20f   :  { %1237 = vmatpush3.bf16.msra.mxu1 %v1445_v18 }
 0x210   :  { %1238 = vmatprep.subr.bf16.mxu1 %v1447_v19 }
 0x213   :  { %1239 = vmatpush3.bf16.msra.mxu1 %v1448_v20 }
 0x214   :  { %1240 = vmatprep.subr.bf16.mxu1 %v1450_v22 }
 0x217   :  { %1241 = vmatpush3.bf16.msra.mxu1 %v1451_v24 }
 0x218   :  { %1242 = vmatprep.subr.bf16.mxu1 %v1453_v28 }
 0x21b   :  { %1243 = vmatpush3.bf16.msra.mxu1 %v1454_v29 }
 0x21c   :  { %1244 = vmatprep.subr.bf16.mxu1 %v1456_v31 }
 0x21f   :  { %1245 = vmatpush3.bf16.msra.mxu1 %v1457_v33 }
 0x220   :  { %1360 = vmatprep.subr.mxu1 %v1533_v0 }
 0x2c2   :  { %v572_v36 = vpop.f32.mrf.mxu1 }
 0x2c3   :  { %v579_v37 = vrot.slane %v572_v36, %v1801_v8  ;;  %v585_v57 = vrot.slane %v572_v36, %v584_v35  ;;  %v974_v36 = vld [vmem:[%s1884_s5] sm:$0x1]  ;;  %s1537_s5 = smov [#allocation7]  }
 0x2c4   :  { %v1339_v38 = vpop.f32.mrf.mxu1 }
 0x2c5   :  { %v580_v55 = vmul.f32 %v579_v37, %v1762_v1  ;;  %v581_v56 = vmul.f32 %v579_v37, %v1764_v3 }
 0x2c7   :  { %v586_v58 = vadd.f32 %v585_v57, %v580_v55  ;;  %v587_v61 = vadd.f32 %v585_v57, %v581_v56  ;;  %v995_v55 = vld [vmem:[%s1885_s6] sm:$0x1]  ;;  %s1101_s6 = sshll.u32 %s1537_s5, 4  ;;  %s1102_s6 = int_to_ptr.vmem [resolvable:$true] %s1101_s6 }
 0x2c8   :  { %s1503_s15 = scalar_lea.vmem %s1102_s6, 256  ;;  %p1508_p11 = scmp.lt.s32.totalorder %s1102_s6, %s1102_s6 }
 0x2c9   :  { %v588_v62 = vmax.f32 %v586_v58, 0.0  ;;  %v589_v63 = vmax.f32 %v587_v61, 0.0  ;;  %p1504_p10 = scmp.ne.s32.totalorder %s1102_s6, %s1503_s15  ;;  %p1509_p12 = scmp.lt.s32.totalorder %s1503_s15, %s1503_s15 }
 0x2cb   :  { %v592_v2 = vrot.slane %v588_v62, 7  ;;  %v593_v4 = vrot.slane %v589_v63, 7  ;;  %v598_v5 = vrot.slane %v588_v62, 1  ;;  %v599_v6 = vrot.slane %v589_v63, 1  ;;  %p1510_p13 = por %p1509_p12, %p1508_p11 }
 0x2cc   :  { %v605_v7 = vpack.c.bf16 %v589_v63, %v588_v62 }
 0x2cd   :  { %v594_v9 = vsel %vm83_vm1, %v592_v2, %v593_v4  ;;  %v600_v10 = vsel %vm90_vm3, %v598_v5, %v599_v6  ;;  %p1511_p0 = pnand %p1510_p13, %p1504_p10 }
 0x2ce   :  { %v1173_v11 = vpack.c.bf16 %v594_v9, %v592_v2  ;;  %v1176_v1 = vpack.c.bf16 %v599_v6, %v600_v10  ;;  %831 = vmatprep.mubr.bf16.mxu1 %v605_v7 }
 0x2d0   :  { %1174 = vmatmul.mubr.msk.bf16.vlgmr.msra.gmra.mxu1 %vm1631_vm6, %v1173_v11  ;;  %1357 = vmatmul.mubr.msk.bf16.vlgmr.msra.gmra.mxu0 %vm1610_vm5, %v1176_v1 }
 0x2d1   :  { %1361 = vmatpush3.msra.mxu1 %v1643_v39  ;;  %1392 = vmatprep.mubr.msk.f32.mxu1 %vm1534_vm0, %v1533_v0 }
 0x2d2   :  { %1362 = vmatprep.subr.mxu1 %v1533_v0  ;;  %1396 = vmatpush3.msk.msra.mxu0 %vm502_vm7, %v1778_v21 }
 0x2d3   :  { %1363 = vmatpush3.msra.mxu1 %v1660_v40  ;;  %1397 = vmatprep.mubr.msk.f32.mxu0 %vm1534_vm0, %v1533_v0 }
 0x2d4   :  { %1364 = vmatprep.subr.mxu1 %v1533_v0 }
 0x2d5   :  { %1365 = vmatpush3.msra.mxu1 %v1667_v41 }
 0x2d6   :  { %1366 = vmatprep.subr.mxu1 %v1533_v0 }
 0x2d7   :  { %1367 = vmatpush3.msra.mxu1 %v1674_v42 }
 0x2d8   :  { %1368 = vmatprep.subr.mxu1 %v1533_v0 }
 0x2d9   :  { %1369 = vmatpush3.msra.mxu1 %v1681_v43 }
 0x2da   :  { %1370 = vmatprep.subr.mxu1 %v1533_v0 }
 0x2db   :  { %1371 = vmatpush3.msra.mxu1 %v1688_v44 }
 0x2dc   :  { %1372 = vmatprep.subr.mxu1 %v1533_v0 }
 0x2dd   :  { %1373 = vmatpush3.msra.mxu1 %v1695_v45 }
 0x2de   :  { %1374 = vmatprep.subr.mxu1 %v1533_v0 }
 0x2df   :  { %1375 = vmatpush3.msra.mxu1 %v1702_v46 }
 0x2e0   :  { %1376 = vmatprep.subr.mxu1 %v1533_v0 }
 0x2e1   :  { %1377 = vmatpush3.msra.mxu1 %v1709_v47 }
 0x2e2   :  { %1378 = vmatprep.subr.mxu1 %v1533_v0 }
 0x2e3   :  { %1379 = vmatpush3.msra.mxu1 %v1716_v48 }
 0x2e4   :  { %1380 = vmatprep.subr.mxu1 %v1533_v0 }
 0x2e5   :  { %1381 = vmatpush3.msra.mxu1 %v1723_v49 }
 0x2e6   :  { %1382 = vmatprep.subr.mxu1 %v1533_v0 }
 0x2e7   :  { %1383 = vmatpush3.msra.mxu1 %v1729_v50 }
 0x2e8   :  { %1384 = vmatprep.subr.mxu1 %v1533_v0 }
 0x2e9   :  { %1385 = vmatpush3.msra.mxu1 %v1735_v51 }
 0x2ea   :  { %1386 = vmatprep.subr.mxu1 %v1533_v0 }
 0x2eb   :  { %1387 = vmatpush3.msra.mxu1 %v1742_v52 }
 0x2ec   :  { %1388 = vmatprep.subr.mxu1 %v1533_v0 }
 0x2ed   :  { %1389 = vmatpush3.msra.mxu1 %v1749_v53 }
 0x2ee   :  { %1390 = vmatprep.subr.mxu1 %v1533_v0 }
 0x2ef   :  { %1391 = vmatpush3.msra.mxu1 %v1756_v54 }
 0x390   :  { %v1246_v23 = vpop.f32.mrf.mxu1  ;;  %v874_v32 = vpop.f32.mrf.mxu0 }
 0x392   :  { %v1247_v39 = vpop.f32.mrf.mxu1  ;;  %v1358_v40 = vpop.f32.mrf.mxu0 }
 0x393   :  { %v1248_v41 = vadd.f32 %v1247_v39, %v1246_v23 }
 0x394   :  { %v1249_v42 = vpop.f32.mrf.mxu1  ;;  %v877_v43 = vpop.f32.mrf.mxu0 }
 0x395   :  { %v875_v46 = vadd.f32 %v1248_v41, %v874_v32 }
 0x396   :  { %v1250_v44 = vpop.f32.mrf.mxu1  ;;  %v1359_v45 = vpop.f32.mrf.mxu0 }
 0x397   :  { %v1251_v47 = vadd.f32 %v1250_v44, %v1249_v42  ;;  %v888_v49 = vmul.f32 %v875_v46, %v875_v46 }
 0x399   :  { %v878_v48 = vadd.f32 %v1251_v47, %v877_v43 }
 0x39b   :  { %v881_v50 = vadd.f32 %v878_v48, %v875_v46  ;;  %v889_v51 = vmul.f32 %v878_v48, %v878_v48 }
 0x39d   :  { %v882_v52 = vrot.slane %v881_v50, 4  ;;  %v890_v53 = vadd.f32 %v889_v51, %v888_v49 }
 0x39f   :  { %v883_v0 = vadd.f32 %v882_v52, %v881_v50  ;;  %v891_v3 = vrot.slane %v890_v53, 4 }
 0x3a1   :  { %v884_v54 = vrot.slane %v883_v0, 2  ;;  %v892_v21 = vadd.f32 %v891_v3, %v890_v53 }
 0x3a3   :  { %v885_v12 = vadd.f32 %v884_v54, %v883_v0  ;;  %v893_v13 = vrot.slane %v892_v21, 2 }
 0x3a5   :  { %v886_v14 = vrot.slane %v885_v12, 1  ;;  %v894_v15 = vadd.f32 %v893_v13, %v892_v21 }
 0x3a7   :  { %v895_v16 = vrot.slane %v894_v15, 1  ;;  %v887_v17 = vadd.f32 %v886_v14, %v885_v12 }
 0x3a9   :  { %v896_v18 = vadd.f32 %v895_v16, %v894_v15 }
 0x3ab   :  { %v897_v19 = vsel %vm83_vm1, %v887_v17, %v896_v18 }
 0x3ac   :  { %1393 = vmatmul.mubr.f32.vlgmr.msra.gmra.mxu1 %v897_v19 }
 0x46c   :  { %v964_v20 = vpop.f32.mrf.mxu1 }
 0x46d   :  { %v968_v22 = vmul.f32 0.001953125, %v964_v20 }
 0x46e   :  { %v1394_v24 = vpop.f32.mrf.mxu1 }
 0x46f   :  { %v969_v27 = vmul.f32 %v968_v22, %v968_v22 }
 0x471   :  { %v971_v28 = vrot.slane %v969_v27, 7 }
 0x473   :  { %v973_v29 = vsub.f32 %v968_v22, %v971_v28 }
 0x475   :  { %v975_v30 = vadd.f32 1e-05, %v973_v29 }
 0x477   :  { %1461 = vrsqrt.f32 %v975_v30 }
 0x484   :  { %v1462_v31 = vpop.eup %1461 }
 0x485   :  { %v984_v33 = vrot.slane %v1462_v31, %v1790_v60 }
 0x487   :  { %v985_v34 = vcombine.high %v984_v33, %v984_v33 }
 0x489   :  { %v992_v37 = vrot.slane %v985_v34, %v1790_v60 }
 0x48b   :  { %v994_v38 = vmul.f32 %v992_v37, %v974_v36 }
 0x48d   :  { %v996_v56 = vmul.f32 %v994_v38, %v968_v22 }
 0x48f   :  { %v997_v57 = vsub.f32 %v995_v55, %v996_v56 }
 0x491   :  { %v1002_v58 = vrot.slane %v997_v57, %v1801_v8 }
 0x493   :  { %v1004_v61 = vsel %vm83_vm1, %v994_v38, %v1002_v58 }
 0x494   :  { %1398 = vmatmul.mubr.msk.f32.vlgmr.msra.gmra.mxu0 %vm498_vm8, %v1004_v61 }
 0x554   :  { %v1074_v62 = vpop.f32.mrf.mxu0 }
 0x555   :  { %v1081_v63 = vrot.slane %v1074_v62, %v1801_v8  ;;  %v1087_v60 = vrot.slane %v1074_v62, %v584_v35 }
 0x556   :  { %v1399_v2 = vpop.f32.mrf.mxu0 }
 0x557   :  { %v1082_v4 = vmul.f32 %v1081_v63, %v875_v46  ;;  %v1083_v5 = vmul.f32 %v1081_v63, %v878_v48 }
 0x559   :  { %v1088_v6 = vadd.f32 %v1087_v60, %v1082_v4  ;;  %v1089_v7 = vadd.f32 %v1087_v60, %v1083_v5 }
 0x55b   :  { %v1090_v9 = vadd.f32 %v1088_v6, %v1618_v25  ;;  %v1091_v10 = vadd.f32 %v1089_v7, %v1623_v26 }
 0x55d   :  { %v1092_v11 = vmax.f32 %v1090_v9, 0.0  ;;  %v1093_v1 = vmax.f32 %v1091_v10, 0.0 }
 0x55f   :  { %1094 = vst [vmem:[#allocation7] sm:$0xff] %v1092_v11  ;;  %1095 = vst [vmem:[#allocation7 + $0x8] sm:$0xff] %v1093_v1 }
 0x560   :  { %1514 = shalt.err (!%p1511_p0)
}
 0x561   :  { %s1538_s16 = smov 128   ;;  %s1539_s17 = smov 8  }
 0x562   :  { %1107 = dma.vmem_to_hbm [thread:$0]  %s1102_s6, 256, %s1888_s9, [#allocation4], %s1538_s16, %s1538_s16, %s1539_s17  }
 0x563   :  { %1527 = dma.done.wait [#allocation4], 256  }
 0x564   :  { %1528 = vsyncadd [#allocation4], 4294967040 }
 0x565   :  { %1111 = vsyncpa [#allocation3], 1 }
 0x566   :  { %1112 = vsyncpa [#allocation6], 1 }
 0x567   :  { %1113 = vsyncpa [#allocation4], 1 }

</bundles_post_ra>
